<compile_context>
chip_gen: v6e
topology: v6e:2x2x1
jax: 0.10.0
libtpu: 0.0.40
codegen_flags: <defaults>
</compile_context>

<pallas_src>
import jax
import jax.numpy as jnp
from jax import lax
from jax.experimental import pallas as pl
from jax.experimental.pallas import tpu as pltpu

_MIB = 1024 * 1024


def _ce_kernel(logits_ref, tgt_ref, ce_ref):
    """Per-row cross entropy for one (tm, V) row tile.

    ce_i = logsumexp(x_i) - x_i[t_i]
         = log(sum_j exp(x_ij - m_i)) - (x_i[t_i] - m_i),   m_i = max_j x_ij,
    so the row max cancels and the target logit is gathered from the already
    shifted tile (one fewer full-tile pass than the naive form).
    """
    x = logits_ref[...]                                    # (tm, V) native dtype
    tgt = tgt_ref[...]                                     # (tm, 1) int32

    m = jnp.max(x, axis=-1, keepdims=True)                 # (tm, 1) native dtype
    # NOTE: for bf16 inputs the shift (x - m) is rounded to bf16 before the
    # f32 exp/accumulate -- fine for a training loss, slightly off an f32 ref.
    xm = (x - m).astype(jnp.float32)                       # (tm, V) f32 shifted logits

    # Target gather via one-hot compare + lane reduction on the shifted tile.
    # Out-of-range targets (e.g. ignore_index=-100 style) match no column and
    # yield tgt_shift = 0; such rows must be masked by the caller (they are in
    # this module, via `masks`).
    col = lax.broadcasted_iota(jnp.int32, xm.shape, 1)     # (tm, V) i32
    tgt_shift = jnp.sum(jnp.where(col == tgt, xm, 0.0),
                        axis=-1, keepdims=True)            # (tm, 1) f32

    # Stable log-sum-exp of the shifted logits (the +m cancels with -m above).
    sumexp = jnp.sum(jnp.exp(xm), axis=-1, keepdims=True)  # (tm, 1) f32

    ce_ref[...] = jnp.log(sumexp) - tgt_shift              # (tm, 1) f32


def _vmem_capacity_bytes(default=64 * _MIB):
    """Per-core VMEM capacity; conservative 64 MiB fallback (fits all gens)."""
    try:
        info = pltpu.get_tpu_info()
        cap = getattr(info, "vmem_capacity_bytes", None)
        if cap:
            return int(cap)
    except Exception:
        pass
    return default


def _choose_tile_rows(N, V, itemsize, vmem_limit_bytes, tm):
    """Pick the row-tile height tm (a legal, budget-respecting sublane tile)."""
    row_mult = 16 if itemsize < 4 else 8        # bf16 packs 2 rows per sublane

    if tm is None:
        # f32-equivalent block byte target: 2x (double-buffered) logits blocks
        # plus ~4 block-sized f32 temporaries must fit the scoped limit with
        # headroom for Mosaic internal scratch and the lane-padded (tm, 1)
        # tgt/ce buffers -> ~6x the f32 block.  Multi-MiB blocks keep the
        # ~0.35us per-grid-step overhead small.
        block_target = min(8 * _MIB, max(1 * _MIB, (vmem_limit_bytes - 8 * _MIB) // 6))
        tm = block_target // max(1, V * 4)
    tm = int(tm)

    if N < row_mult:
        # Tiny inputs: a single block equal to the full row extent (legal
        # because the block dim equals the array dim).
        return max(N, 1)

    tm = max(row_mult, min(tm, 2048))            # cap bounds (tm,1) lane padding
    if N >= 2 * row_mult:
        # >= 2 grid steps so dimension_semantics=("parallel",) can shard the
        # grid across v7x's two TensorCores.
        tm = min(tm, (N // 2 // row_mult) * row_mult)
    tm = min(tm, (N // row_mult) * row_mult)
    return max((tm // row_mult) * row_mult, row_mult)


def lm_cross_entropy_loss(out_classes, target_classes, masks, *,
                          tm=None, vmem_limit_bytes=None):
    """JAX wrapper matching LMCrossEntropyLoss.forward."""
    B, T, V = out_classes.shape
    N = B * T

    # No padding of the logits: tail rows are handled by partial edge blocks.
    logits = out_classes.reshape(N, V)
    tgt = target_classes.reshape(N, 1).astype(jnp.int32)
    nmask = jnp.logical_not(masks).reshape(N).astype(jnp.float32)

    itemsize = jnp.dtype(logits.dtype).itemsize

    if vmem_limit_bytes is None:
        # ~40 MiB on 64 MiB-VMEM parts (v7x), ~80 MiB on 128 MiB parts.
        vmem_limit_bytes = (5 * _vmem_capacity_bytes()) // 8
    vmem_limit_bytes = int(vmem_limit_bytes)

    tm = _choose_tile_rows(N, V, itemsize, vmem_limit_bytes, tm)
    grid = (pl.cdiv(N, tm),)

    cost = pl.CostEstimate(
        flops=int(7 * N * V),
        transcendentals=int(N * V),
        bytes_accessed=int(N * V * itemsize + 8 * N),
    )

    ce = pl.pallas_call(
        _ce_kernel,
        out_shape=jax.ShapeDtypeStruct((N, 1), jnp.float32),
        grid_spec=pltpu.PrefetchScalarGridSpec(
            num_scalar_prefetch=0,
            grid=grid,
            in_specs=[
                pl.BlockSpec((tm, V), lambda i: (i, 0)),
                pl.BlockSpec((tm, 1), lambda i: (i, 0)),
            ],
            out_specs=pl.BlockSpec((tm, 1), lambda i: (i, 0)),
        ),
        compiler_params=pltpu.CompilerParams(
            dimension_semantics=("parallel",),   # independent row tiles
            vmem_limit_bytes=vmem_limit_bytes,
        ),
        cost_estimate=cost,
    )(logits, tgt)

    # Masked mean in plain JAX (fused O(N) epilogue).  Note: if every position
    # is masked the result is NaN/Inf, matching the PyTorch sum/0 behavior.
    return jnp.sum(ce[:, 0] * nmask) / jnp.sum(nmask)


def _reference(out_classes, target_classes, masks):
    """Pure-JAX reference of the PyTorch forward, for verification."""
    B, T, V = out_classes.shape
    logits = out_classes.reshape(B * T, V).astype(jnp.float32)
    tgt = target_classes.reshape(-1).astype(jnp.int32)
    nmask = jnp.logical_not(masks.reshape(-1)).astype(jnp.float32)
    logz = jax.scipy.special.logsumexp(logits, axis=-1)
    ce = logz - jnp.take_along_axis(logits, tgt[:, None], axis=-1)[:, 0]
    return jnp.sum(ce * nmask) / jnp.sum(nmask)


if __name__ == "__main__":
    key = jax.random.PRNGKey(0)
    k1, k2, k3 = jax.random.split(key, 3)

    B, T, V = 2, 8, 128  # small shapes: batch=2, seq=8, vocab=128
    out_classes = jax.random.normal(k1, (B, T, V), dtype=jnp.float32)
    target_classes = jax.random.randint(k2, (B, T), 0, V, dtype=jnp.int32)
    # masks: True means "ignore this position" (loss uses logical_not(masks)).
    masks = jax.random.bernoulli(k3, p=0.3, shape=(B, T))

    loss = lm_cross_entropy_loss(out_classes, target_classes, masks)
    loss = jax.block_until_ready(loss)

    ref = _reference(out_classes, target_classes, masks)
    assert jnp.allclose(loss, ref, rtol=1e-5, atol=1e-5), (loss, ref)

    print("KERNEL_OK")
</pallas_src>

<mosaic_0001>
module attributes {stable_mosaic.version = 11 : i64} {
  func.func @_ce_kernel(%arg0: i32, %arg1: memref<8x128xf32, #tpu.memory_space<vmem>>, %arg2: memref<8x1xi32, #tpu.memory_space<vmem>>, %arg3: memref<8x1xf32, #tpu.memory_space<vmem>>) attributes {dimension_semantics = [#tpu.dimension_semantics<parallel>], iteration_bounds = array<i64: 2>, scalar_prefetch = 0 : i64, scratch_operands = 0 : i64, tpu.core_type = #tpu.core_type<tc>, window_params = [{transform_indices = @transform_0, window_bounds = array<i64: 8, 128>}, {transform_indices = @transform_1, window_bounds = array<i64: 8, 1>}, {transform_indices = @transform_2, window_bounds = array<i64: 8, 1>}]} {
    %c0 = arith.constant 0 : index
    %c0_0 = arith.constant 0 : index
    %0 = vector.load %arg1[%c0, %c0_0] : memref<8x128xf32, #tpu.memory_space<vmem>>, vector<8x128xf32>
    %c0_1 = arith.constant 0 : index
    %c0_2 = arith.constant 0 : index
    %1 = vector.load %arg2[%c0_1, %c0_2] : memref<8x1xi32, #tpu.memory_space<vmem>>, vector<8x1xi32>
    %cst = arith.constant dense<0xFF800000> : vector<8xf32>
    %2 = vector.multi_reduction <maximumf>, %0, %cst [1] : vector<8x128xf32> to vector<8xf32>
    %3 = vector.shape_cast %2 : vector<8xf32> to vector<8x1xf32>
    %4 = vector.broadcast %3 : vector<8x1xf32> to vector<8x128xf32>
    %5 = arith.subf %0, %4 : vector<8x128xf32>
    %6 = tpu.iota {dimensions = array<i32: 1>} : vector<8x128xi32>
    %7 = vector.broadcast %1 : vector<8x1xi32> to vector<8x128xi32>
    %8 = arith.cmpi eq, %6, %7 : vector<8x128xi32>
    %cst_3 = arith.constant 0.000000e+00 : f32
    %9 = vector.broadcast %cst_3 : f32 to vector<8x128xf32>
    %10 = arith.select %8, %5, %9 : vector<8x128xi1>, vector<8x128xf32>
    %cst_4 = arith.constant dense<0.000000e+00> : vector<8xf32>
    %11 = vector.multi_reduction <add>, %10, %cst_4 [1] : vector<8x128xf32> to vector<8xf32>
    %12 = vector.shape_cast %11 : vector<8xf32> to vector<8x1xf32>
    %13 = math.exp %5 : vector<8x128xf32>
    %cst_5 = arith.constant dense<0.000000e+00> : vector<8xf32>
    %14 = vector.multi_reduction <add>, %13, %cst_5 [1] : vector<8x128xf32> to vector<8xf32>
    %15 = vector.shape_cast %14 : vector<8xf32> to vector<8x1xf32>
    %16 = math.log %15 : vector<8x1xf32>
    %17 = arith.subf %16, %12 : vector<8x1xf32>
    %c0_6 = arith.constant 0 : index
    %c0_7 = arith.constant 0 : index
    %18 = vector.load %arg3[%c0_6, %c0_7] : memref<8x1xf32, #tpu.memory_space<vmem>>, vector<8x1xf32>
    tpu.vector_store %arg3[%c0_6, %c0_7], %17 {strides = array<i32>} : memref<8x1xf32, #tpu.memory_space<vmem>>, vector<8x1xf32>,
    return
  }
  func.func @transform_0(%arg0: i32) -> (i32, i32) {
    %c0_i32 = arith.constant 0 : i32
    %c0_i32_0 = arith.constant 0 : i32
    return %arg0, %c0_i32 : i32, i32
  }
  func.func @transform_1(%arg0: i32) -> (i32, i32) {
    %c0_i32 = arith.constant 0 : i32
    %c0_i32_0 = arith.constant 0 : i32
    return %arg0, %c0_i32 : i32, i32
  }
  func.func @transform_2(%arg0: i32) -> (i32, i32) {
    %c0_i32 = arith.constant 0 : i32
    %c0_i32_0 = arith.constant 0 : i32
    return %arg0, %c0_i32 : i32, i32
  }
}

</mosaic_0001>

<bundles_post_ra>
// kernel: tpu_custom_call.1
= control target key start
LH: loop header
LB: loop body
LE: loop exit
PB: predicated region body
PF: predicated region fallthrough
CT: control target
= control target key end

     0   :  { %s292_s9 = smov 0   ;;  %s312_s0 = inlined_call_operand.vmem [shape: f32[16,128], index: 0, kind: input, shape index: {}]   ;;  %s313_s1 = inlined_call_operand.vmem [shape: s32[16,1], index: 1, kind: input, shape index: {}]   ;;  %s314_s2 = inlined_call_operand.vmem [shape: f32[16,1], index: 2, kind: output, shape index: {}]  }
   0x1 LB: > { %s244_s10 = sadd.s32 4294967295, %s274_s9   ;;  %p248_p0 = scmp.ge.s32.totalorder %s274_s9, 1  ;;  %s274_s9 = sphi %s292_s9, %s12_s9  }
   0x2   : > { %p120_p1 = scmp.lt.s32.totalorder %s274_s9, 3 }
   0x4   : > { %p121_p2 = pnand %p248_p0, %p120_p1 }
   0x5   : > { %p144_p3 = scmp.lt.s32.totalorder (!%p121_p2), %s244_s10, 1 }
   0x6   : > { %124 = sbr.rel (%p121_p2) target bundleno = 328 (0x148), region = 28 }
   0xb   : > { %v276_v0 = vmov 0   ;;  %s316_s10 = smov (!%p144_p3, %s244_s10), 1  ;;  %v161_v6 = vlaneseq  ;;  %vm177_vm1 = vcmask 7168  }
   0xc   : > { %263 = vset.pattern.permute.xlu0 %v276_v0  ;;  %s249_s11 = sshll.u32 %s316_s10, 3 }
   0xd   : > { %s147_s14 = scalar_lea.vmem %s312_s0, %s249_s11  ;;  %s151_s17 = scalar_lea.vmem %s313_s1, %s249_s11  ;;  %v162_v7 = vand.u32 127, %v161_v6 }
   0xe   : > { %v156_v1 = vld [vmem:[%s147_s14] sm:$0xff]  ;;  %s155_s20 = scalar_lea.vmem %s314_s2, %s249_s11 }
   0xf   : > { %158 = vmax.xlane.f32.xlu0 %v156_v1  ;;  %v157_v2 = vld [vmem:[%s151_s17] sm:$0xff] }
  0x25   : > { %164 = vperm.xlu0 %263, %v157_v2  }
  0x98   : > { %v159_v3 = vpop.xlane.xlu0 %158 }
  0x99   : > { %v160_v4 = vsub.f32 %v156_v1, %v159_v3 }
  0x9b   : > { %v170_v5 = vmul.f32 1.442695, %v160_v4 }
  0x9d   : > { %264 = vpow2.f32 %v170_v5 }
  0xa0   : > { %v165_v8 = vpop.permute.xlu0 %164 }
  0xa1   : > { %vm166_vm0 = vcmp.eq.s32.totalorder %v162_v7, %v165_v8 }
  0xa2   : > { %v167_v10 = vsel %vm166_vm0, %v160_v4, 0.0 }
  0xaa   : > { %v265_v9 = vpop.eup %264 }
  0xab   : > { %172 = vadd.xlane.f32.xlu1 %v265_v9 }
  0xaf   : > { %168 = vadd.xlane.f32.xlu1 %v167_v10 }
 0x134   : > { %v173_v11 = vpop.xlane.xlu1 %172 }
 0x135   : > { %266 = vlog2.f32 %v173_v11 }
 0x138   : > { %v169_v14 = vpop.xlane.xlu1 %168 }
 0x142   : > { %v267_v12 = vpop.eup %266 }
 0x143   : > { %v175_v13 = vmul.f32 0.6931472, %v267_v12 }
 0x145   : > { %v176_v15 = vsub.f32 %v175_v13, %v169_v14 }
 0x147   : > { %178 = vst.msk [vmem:[%s155_s20] sm:$0xff] %vm177_vm1, %v176_v15 }
 0x148 PF: > { %s12_s9 = sadd.s32 1, %s274_s9  }
 0x149   : > { %p9_p4 = scmp.ge.s32.totalorder %s12_s9, 4  }
 0x14b   :  { %11 = sbr.rel (!%p9_p4) target bundleno = 1 (0x1), region = 61 }

</bundles_post_ra>
